<compile_context>
chip_gen: v7x
topology: tpu7x:2x2x1
jax: 0.10.0
libtpu: 0.0.40
codegen_flags: <defaults>
</compile_context>

<pallas_src>
import functools
import math

import jax
import jax.numpy as jnp
from jax.experimental import pallas as pl
from jax.experimental.pallas import tpu as pltpu


# ---------------------------------------------------------------------------
# Kernel 1: global avg/max pooling over spatial tiles + shared MLP + sigmoid
# ---------------------------------------------------------------------------
def _pool_mlp_kernel(x_ref, w1_ref, b1_ref, w2_ref, b2_ref,
                     gate_ref, sum_ref, max_ref, *, inv_hw):
    # x_ref:    (N, C, T)   spatial tile, lanes = spatial (lane-dense)
    # w1_ref:   (C, Ch)     Linear1 weight, stored (in, out)
    # b1_ref:   (1, Ch)
    # w2_ref:   (Ch, C)     Linear2 weight, stored (in, out)
    # b2_ref:   (1, C)
    # gate_ref: (N, C)      output: sigmoid(MLP(avg) + MLP(max)), grid-resident
    # sum_ref/max_ref: (N, C) VMEM scratch accumulators
    t = pl.program_id(0)
    nt = pl.num_programs(0)

    @pl.when(t == 0)
    def _():
        sum_ref[...] = jnp.zeros_like(sum_ref)
        max_ref[...] = jnp.full_like(max_ref, -jnp.inf)

    xt = x_ref[...]
    sum_ref[...] += jnp.sum(xt, axis=-1)                  # XLU lane reduction
    max_ref[...] = jnp.maximum(max_ref[...], jnp.max(xt, axis=-1))

    @pl.when(t == nt - 1)
    def _():
        avg = sum_ref[...] * inv_hw                       # AdaptiveAvgPool2d(1)
        mx = max_ref[...]                                 # AdaptiveMaxPool2d(1)

        def mlp(v):
            h = jnp.dot(v, w1_ref[...], preferred_element_type=jnp.float32)
            h = h + b1_ref[...]
            h = jnp.where(h > 0, h, 0.01 * h)             # LeakyReLU(0.01)
            o = jnp.dot(h, w2_ref[...], preferred_element_type=jnp.float32)
            return o + b2_ref[...]

        logits = mlp(avg) + mlp(mx)                       # shared-weight MLP
        gate_ref[...] = 1.0 / (1.0 + jnp.exp(-logits))    # sigmoid (EUP exp)


# ---------------------------------------------------------------------------
# Kernel 2: apply per-(n, c) gate to every spatial tile
# ---------------------------------------------------------------------------
def _apply_gate_kernel(x_ref, gate_ref, out_ref):
    # x_ref/out_ref: (N, C, T), gate_ref: (N, C)
    out_ref[...] = x_ref[...] * gate_ref[...][:, :, None]


# ---------------------------------------------------------------------------
# Parameters (PyTorch nn.Linear default init, weights stored as (in, out))
# ---------------------------------------------------------------------------
def make_channel_attention_params(key, input_channels, reduction_ratio=16):
    hidden = input_channels // reduction_ratio
    assert hidden >= 1, "input_channels // reduction_ratio must be >= 1"
    k1, k2, k3, k4 = jax.random.split(key, 4)

    def linear_init(kw, kb, fan_in, fan_out):
        bound = 1.0 / math.sqrt(fan_in)
        w = jax.random.uniform(kw, (fan_in, fan_out), jnp.float32, -bound, bound)
        b = jax.random.uniform(kb, (1, fan_out), jnp.float32, -bound, bound)
        return w, b

    w1, b1 = linear_init(k1, k2, input_channels, hidden)
    w2, b2 = linear_init(k3, k4, hidden, input_channels)
    return dict(w1=w1, b1=b1, w2=w2, b2=b2)


# ---------------------------------------------------------------------------
# Wrapper
# ---------------------------------------------------------------------------
def _spatial_tile(n, c, hw, max_tile=512, budget_bytes=2 << 20):
    """Largest lane-aligned spatial tile dividing hw within a VMEM budget
    (conservative enough for v7x's 64 MiB once double-buffered)."""
    if hw % 128 != 0:
        return hw                      # full-extent block (always legal)
    t = 128
    while (t * 2 <= min(hw, max_tile)
           and hw % (t * 2) == 0
           and n * c * (t * 2) * 4 <= budget_bytes):
        t *= 2
    return t


def channel_attention_forward(x_nchw, params):
    """x_nchw: (N, C, H, W) float32 -> (N, C, H, W) float32."""
    N, C, H, W = x_nchw.shape
    HW = H * W
    x = x_nchw.reshape(N, C, HW).astype(jnp.float32)      # NCHW stays, HW = lanes

    T = _spatial_tile(N, C, HW)
    grid = (HW // T,)

    x_spec = pl.BlockSpec((N, C, T), lambda t: (0, 0, t))
    gate_spec = pl.BlockSpec((N, C), lambda t: (0, 0))

    def full_spec(a):
        return pl.BlockSpec(a.shape, lambda t: (0, 0))

    w1, b1, w2, b2 = params["w1"], params["b1"], params["w2"], params["b2"]

    # Pass 1: pooled stats + MLP + sigmoid gate  (spatial axis is a reduction)
    gate = pl.pallas_call(
        functools.partial(_pool_mlp_kernel, inv_hw=1.0 / HW),
        out_shape=jax.ShapeDtypeStruct((N, C), jnp.float32),
        grid=grid,
        in_specs=[x_spec, full_spec(w1), full_spec(b1),
                  full_spec(w2), full_spec(b2)],
        out_specs=gate_spec,
        scratch_shapes=[pltpu.VMEM((N, C), jnp.float32),   # running sum
                        pltpu.VMEM((N, C), jnp.float32)],  # running max
        compiler_params=pltpu.CompilerParams(
            dimension_semantics=("arbitrary",)),
    )(x, w1, b1, w2, b2)

    # Pass 2: scale every spatial tile by the gate (fully parallel axis)
    out = pl.pallas_call(
        _apply_gate_kernel,
        out_shape=jax.ShapeDtypeStruct((N, C, HW), jnp.float32),
        grid=grid,
        in_specs=[x_spec, gate_spec],
        out_specs=pl.BlockSpec((N, C, T), lambda t: (0, 0, t)),
        compiler_params=pltpu.CompilerParams(
            dimension_semantics=("parallel",)),
    )(x, gate)

    return out.reshape(N, C, H, W)


# ---------------------------------------------------------------------------
# Reference (pure JAX) for a sanity check
# ---------------------------------------------------------------------------
def _reference(x, params):
    avg = jnp.mean(x, axis=(2, 3))
    mx = jnp.max(x, axis=(2, 3))

    def mlp(v):
        h = v @ params["w1"] + params["b1"]
        h = jnp.where(h > 0, h, 0.01 * h)
        return h @ params["w2"] + params["b2"]

    gate = jax.nn.sigmoid(mlp(avg) + mlp(mx))
    return x * gate[:, :, None, None]


if __name__ == "__main__":
    key = jax.random.PRNGKey(0)
    k_x, k_p = jax.random.split(key)

    # input_channels must be >= reduction_ratio for the MLP bottleneck to exist
    N, C, H, W = 2, 32, 32, 32
    reduction_ratio = 16

    x = jax.random.normal(k_x, (N, C, H, W), jnp.float32)
    params = make_channel_attention_params(k_p, C, reduction_ratio)

    y = channel_attention_forward(x, params)
    jax.block_until_ready(y)
    assert y.shape == (N, C, H, W)

    y_ref = _reference(x, params)
    assert jnp.allclose(y, y_ref, rtol=1e-3, atol=1e-3), \
        float(jnp.max(jnp.abs(y - y_ref)))

    print("KERNEL_OK")
</pallas_src>

<mosaic_0001>
module attributes {stable_mosaic.version = 11 : i64} {
  func.func @_pool_mlp_kernel(%arg0: i32, %arg1: memref<2x32x512xf32, #tpu.memory_space<vmem>>, %arg2: memref<32x2xf32, #tpu.memory_space<vmem>>, %arg3: memref<1x2xf32, #tpu.memory_space<vmem>>, %arg4: memref<2x32xf32, #tpu.memory_space<vmem>>, %arg5: memref<1x32xf32, #tpu.memory_space<vmem>>, %arg6: memref<2x32xf32, #tpu.memory_space<vmem>>, %arg7: memref<2x32xf32, #tpu.memory_space<vmem>>, %arg8: memref<2x32xf32, #tpu.memory_space<vmem>>) attributes {dimension_semantics = [#tpu.dimension_semantics<arbitrary>], iteration_bounds = array<i64: 2>, scalar_prefetch = 0 : i64, scratch_operands = 2 : i64, tpu.core_type = #tpu.core_type<tc>, window_params = [{transform_indices = @transform_0, window_bounds = array<i64: 2, 32, 512>}, {pipeline_mode = #tpu.pipeline_mode<synchronous>, transform_indices = @transform_1, window_bounds = array<i64: 32, 2>}, {pipeline_mode = #tpu.pipeline_mode<synchronous>, transform_indices = @transform_2, window_bounds = array<i64: 1, 2>}, {pipeline_mode = #tpu.pipeline_mode<synchronous>, transform_indices = @transform_3, window_bounds = array<i64: 2, 32>}, {pipeline_mode = #tpu.pipeline_mode<synchronous>, transform_indices = @transform_4, window_bounds = array<i64: 1, 32>}, {pipeline_mode = #tpu.pipeline_mode<synchronous>, transform_indices = @transform_5, window_bounds = array<i64: 2, 32>}]} {
    %c0_i32 = arith.constant 0 : i32
    %0 = arith.cmpi eq, %arg0, %c0_i32 : i32
    %1 = arith.extui %0 : i1 to i32
    %c0_i32_0 = arith.constant 0 : i32
    %2 = arith.cmpi ne, %1, %c0_i32_0 : i32
    scf.if %2 {
      %cst_13 = arith.constant 0.000000e+00 : f32
      %15 = vector.broadcast %cst_13 : f32 to vector<2x32xf32>
      %c0_14 = arith.constant 0 : index
      %c0_15 = arith.constant 0 : index
      %16 = vector.load %arg7[%c0_14, %c0_15] : memref<2x32xf32, #tpu.memory_space<vmem>>, vector<2x32xf32>
      tpu.vector_store %arg7[%c0_14, %c0_15], %15 {strides = array<i32>} : memref<2x32xf32, #tpu.memory_space<vmem>>, vector<2x32xf32>,
      %cst_16 = arith.constant 0xFF800000 : f32
      %17 = vector.broadcast %cst_16 : f32 to vector<2x32xf32>
      %c0_17 = arith.constant 0 : index
      %c0_18 = arith.constant 0 : index
      %18 = vector.load %arg8[%c0_17, %c0_18] : memref<2x32xf32, #tpu.memory_space<vmem>>, vector<2x32xf32>
      tpu.vector_store %arg8[%c0_17, %c0_18], %17 {strides = array<i32>} : memref<2x32xf32, #tpu.memory_space<vmem>>, vector<2x32xf32>,
    } else {
    }
    %c0 = arith.constant 0 : index
    %c0_1 = arith.constant 0 : index
    %c0_2 = arith.constant 0 : index
    %3 = vector.load %arg1[%c0, %c0_1, %c0_2] : memref<2x32x512xf32, #tpu.memory_space<vmem>>, vector<2x32x512xf32>
    %c0_3 = arith.constant 0 : index
    %c0_4 = arith.constant 0 : index
    %4 = vector.load %arg7[%c0_3, %c0_4] : memref<2x32xf32, #tpu.memory_space<vmem>>, vector<2x32xf32>
    %cst = arith.constant dense<0.000000e+00> : vector<2x32xf32>
    %5 = vector.multi_reduction <add>, %3, %cst [2] : vector<2x32x512xf32> to vector<2x32xf32>
    %6 = arith.addf %4, %5 : vector<2x32xf32>
    %c0_5 = arith.constant 0 : index
    %c0_6 = arith.constant 0 : index
    %7 = vector.load %arg7[%c0_5, %c0_6] : memref<2x32xf32, #tpu.memory_space<vmem>>, vector<2x32xf32>
    tpu.vector_store %arg7[%c0_5, %c0_6], %6 {strides = array<i32>} : memref<2x32xf32, #tpu.memory_space<vmem>>, vector<2x32xf32>,
    %c0_7 = arith.constant 0 : index
    %c0_8 = arith.constant 0 : index
    %8 = vector.load %arg8[%c0_7, %c0_8] : memref<2x32xf32, #tpu.memory_space<vmem>>, vector<2x32xf32>
    %cst_9 = arith.constant dense<0xFF800000> : vector<2x32xf32>
    %9 = vector.multi_reduction <maximumf>, %3, %cst_9 [2] : vector<2x32x512xf32> to vector<2x32xf32>
    %10 = arith.maximumf %8, %9 : vector<2x32xf32>
    %c0_10 = arith.constant 0 : index
    %c0_11 = arith.constant 0 : index
    %11 = vector.load %arg8[%c0_10, %c0_11] : memref<2x32xf32, #tpu.memory_space<vmem>>, vector<2x32xf32>
    tpu.vector_store %arg8[%c0_10, %c0_11], %10 {strides = array<i32>} : memref<2x32xf32, #tpu.memory_space<vmem>>, vector<2x32xf32>,
    %c1_i32 = arith.constant 1 : i32
    %12 = arith.cmpi eq, %arg0, %c1_i32 : i32
    %13 = arith.extui %12 : i1 to i32
    %c0_i32_12 = arith.constant 0 : i32
    %14 = arith.cmpi ne, %13, %c0_i32_12 : i32
    scf.if %14 {
      %c0_13 = arith.constant 0 : index
      %c0_14 = arith.constant 0 : index
      %15 = vector.load %arg7[%c0_13, %c0_14] : memref<2x32xf32, #tpu.memory_space<vmem>>, vector<2x32xf32>
      %cst_15 = arith.constant 9.765625E-4 : f32
      %16 = vector.broadcast %cst_15 : f32 to vector<2x32xf32>
      %17 = arith.mulf %15, %16 : vector<2x32xf32>
      %c0_16 = arith.constant 0 : index
      %c0_17 = arith.constant 0 : index
      %18 = vector.load %arg8[%c0_16, %c0_17] : memref<2x32xf32, #tpu.memory_space<vmem>>, vector<2x32xf32>
      %c0_18 = arith.constant 0 : index
      %c0_19 = arith.constant 0 : index
      %19 = vector.load %arg2[%c0_18, %c0_19] : memref<32x2xf32, #tpu.memory_space<vmem>>, vector<32x2xf32>
      %cst_20 = arith.constant dense<0.000000e+00> : vector<2x2xf32>
      %20 = tpu.matmul %17, %19, %cst_20 {dimension_numbers = #tpu.dot_dimension_numbers<[1], [0], [0], [1], [0, 0, 1, 1], [], []>} : vector<2x32xf32>, vector<32x2xf32>, vector<2x2xf32> -> vector<2x2xf32>
      %c0_21 = arith.constant 0 : index
      %c0_22 = arith.constant 0 : index
      %21 = vector.load %arg3[%c0_21, %c0_22] : memref<1x2xf32, #tpu.memory_space<vmem>>, vector<1x2xf32>
      %22 = vector.broadcast %21 : vector<1x2xf32> to vector<2x2xf32>
      %23 = arith.addf %20, %22 : vector<2x2xf32>
      %cst_23 = arith.constant 0.000000e+00 : f32
      %24 = vector.broadcast %cst_23 : f32 to vector<2x2xf32>
      %25 = arith.cmpf ogt, %23, %24 : vector<2x2xf32>
      %cst_24 = arith.constant 0.00999999977 : f32
      %26 = vector.broadcast %cst_24 : f32 to vector<2x2xf32>
      %27 = arith.mulf %26, %23 : vector<2x2xf32>
      %28 = arith.select %25, %23, %27 : vector<2x2xi1>, vector<2x2xf32>
      %c0_25 = arith.constant 0 : index
      %c0_26 = arith.constant 0 : index
      %29 = vector.load %arg4[%c0_25, %c0_26] : memref<2x32xf32, #tpu.memory_space<vmem>>, vector<2x32xf32>
      %cst_27 = arith.constant dense<0.000000e+00> : vector<2x32xf32>
      %30 = tpu.matmul %28, %29, %cst_27 {dimension_numbers = #tpu.dot_dimension_numbers<[1], [0], [0], [1], [0, 0, 1, 1], [], []>} : vector<2x2xf32>, vector<2x32xf32>, vector<2x32xf32> -> vector<2x32xf32>
      %c0_28 = arith.constant 0 : index
      %c0_29 = arith.constant 0 : index
      %31 = vector.load %arg5[%c0_28, %c0_29] : memref<1x32xf32, #tpu.memory_space<vmem>>, vector<1x32xf32>
      %32 = vector.broadcast %31 : vector<1x32xf32> to vector<2x32xf32>
      %33 = arith.addf %30, %32 : vector<2x32xf32>
      %c0_30 = arith.constant 0 : index
      %c0_31 = arith.constant 0 : index
      %34 = vector.load %arg2[%c0_30, %c0_31] : memref<32x2xf32, #tpu.memory_space<vmem>>, vector<32x2xf32>
      %cst_32 = arith.constant dense<0.000000e+00> : vector<2x2xf32>
      %35 = tpu.matmul %18, %34, %cst_32 {dimension_numbers = #tpu.dot_dimension_numbers<[1], [0], [0], [1], [0, 0, 1, 1], [], []>} : vector<2x32xf32>, vector<32x2xf32>, vector<2x2xf32> -> vector<2x2xf32>
      %c0_33 = arith.constant 0 : index
      %c0_34 = arith.constant 0 : index
      %36 = vector.load %arg3[%c0_33, %c0_34] : memref<1x2xf32, #tpu.memory_space<vmem>>, vector<1x2xf32>
      %37 = vector.broadcast %36 : vector<1x2xf32> to vector<2x2xf32>
      %38 = arith.addf %35, %37 : vector<2x2xf32>
      %cst_35 = arith.constant 0.000000e+00 : f32
      %39 = vector.broadcast %cst_35 : f32 to vector<2x2xf32>
      %40 = arith.cmpf ogt, %38, %39 : vector<2x2xf32>
      %cst_36 = arith.constant 0.00999999977 : f32
      %41 = vector.broadcast %cst_36 : f32 to vector<2x2xf32>
      %42 = arith.mulf %41, %38 : vector<2x2xf32>
      %43 = arith.select %40, %38, %42 : vector<2x2xi1>, vector<2x2xf32>
      %c0_37 = arith.constant 0 : index
      %c0_38 = arith.constant 0 : index
      %44 = vector.load %arg4[%c0_37, %c0_38] : memref<2x32xf32, #tpu.memory_space<vmem>>, vector<2x32xf32>
      %cst_39 = arith.constant dense<0.000000e+00> : vector<2x32xf32>
      %45 = tpu.matmul %43, %44, %cst_39 {dimension_numbers = #tpu.dot_dimension_numbers<[1], [0], [0], [1], [0, 0, 1, 1], [], []>} : vector<2x2xf32>, vector<2x32xf32>, vector<2x32xf32> -> vector<2x32xf32>
      %c0_40 = arith.constant 0 : index
      %c0_41 = arith.constant 0 : index
      %46 = vector.load %arg5[%c0_40, %c0_41] : memref<1x32xf32, #tpu.memory_space<vmem>>, vector<1x32xf32>
      %47 = vector.broadcast %46 : vector<1x32xf32> to vector<2x32xf32>
      %48 = arith.addf %45, %47 : vector<2x32xf32>
      %49 = arith.addf %33, %48 : vector<2x32xf32>
      %cst_42 = arith.constant 0.000000e+00 : f32
      %50 = vector.broadcast %cst_42 : f32 to vector<2x32xf32>
      %51 = arith.subf %50, %49 : vector<2x32xf32>
      %52 = math.exp %51 : vector<2x32xf32>
      %cst_43 = arith.constant 1.000000e+00 : f32
      %53 = vector.broadcast %cst_43 : f32 to vector<2x32xf32>
      %54 = arith.addf %53, %52 : vector<2x32xf32>
      %cst_44 = arith.constant 1.000000e+00 : f32
      %55 = vector.broadcast %cst_44 : f32 to vector<2x32xf32>
      %56 = arith.divf %55, %54 : vector<2x32xf32>
      %c0_45 = arith.constant 0 : index
      %c0_46 = arith.constant 0 : index
      %57 = vector.load %arg6[%c0_45, %c0_46] : memref<2x32xf32, #tpu.memory_space<vmem>>, vector<2x32xf32>
      tpu.vector_store %arg6[%c0_45, %c0_46], %56 {strides = array<i32>} : memref<2x32xf32, #tpu.memory_space<vmem>>, vector<2x32xf32>,
    } else {
    }
    return
  }
  func.func @transform_0(%arg0: i32) -> (i32, i32, i32) {
    %c0_i32 = arith.constant 0 : i32
    %c0_i32_0 = arith.constant 0 : i32
    %c0_i32_1 = arith.constant 0 : i32
    return %c0_i32, %c0_i32_0, %arg0 : i32, i32, i32
  }
  func.func @transform_1(%arg0: i32) -> (i32, i32) {
    %c0_i32 = arith.constant 0 : i32
    %c0_i32_0 = arith.constant 0 : i32
    %c0_i32_1 = arith.constant 0 : i32
    return %c0_i32, %c0_i32_0 : i32, i32
  }
  func.func @transform_2(%arg0: i32) -> (i32, i32) {
    %c0_i32 = arith.constant 0 : i32
    %c0_i32_0 = arith.constant 0 : i32
    %c0_i32_1 = arith.constant 0 : i32
    return %c0_i32, %c0_i32_0 : i32, i32
  }
  func.func @transform_3(%arg0: i32) -> (i32, i32) {
    %c0_i32 = arith.constant 0 : i32
    %c0_i32_0 = arith.constant 0 : i32
    %c0_i32_1 = arith.constant 0 : i32
    return %c0_i32, %c0_i32_0 : i32, i32
  }
  func.func @transform_4(%arg0: i32) -> (i32, i32) {
    %c0_i32 = arith.constant 0 : i32
    %c0_i32_0 = arith.constant 0 : i32
    %c0_i32_1 = arith.constant 0 : i32
    return %c0_i32, %c0_i32_0 : i32, i32
  }
  func.func @transform_5(%arg0: i32) -> (i32, i32) {
    %c0_i32 = arith.constant 0 : i32
    %c0_i32_0 = arith.constant 0 : i32
    %c0_i32_1 = arith.constant 0 : i32
    return %c0_i32, %c0_i32_0 : i32, i32
  }
}

</mosaic_0001>

<bundles_post_ra>
// kernel: tpu_custom_call.1
= control target key start
LH: loop header
LB: loop body
LE: loop exit
PB: predicated region body
PF: predicated region fallthrough
CT: control target
= control target key end

     0   :  { %10 = vsyncpa [#allocation5], 0  ;;  %s1338_s0 = inlined_call_operand.hbm [shape: f32[2,32,1024], index: 0, kind: input, shape index: {}]   ;;  %s1339_s1 = inlined_call_operand.vmem [shape: f32[32,2], index: 1, kind: input, shape index: {}]   ;;  %s1340_s2 = inlined_call_operand.vmem [shape: f32[1,2], index: 2, kind: input, shape index: {}]   ;;  %s1341_s3 = inlined_call_operand.vmem [shape: f32[2,32], index: 3, kind: input, shape index: {}]   ;;  %s1342_s4 = inlined_call_operand.vmem [shape: f32[1,32], index: 4, kind: input, shape index: {}]   ;;  %s1343_s5 = inlined_call_operand.hbm [shape: f32[2,32], index: 5, kind: output, shape index: {}]  }
   0x1   :  { %12 = vsyncpa [#allocation5 + $0x1], 0 }
   0x2   :  { %13 = vsyncpa [#allocation6], 0  ;;  %s1136_s18 = smov 0   ;;  %s1138_s19 = smov 0  }
   0x3   :  { %s1140_s20 = smov 0   ;;  %s1142_s21 = smov 0  }
   0x4 LB: > { %s1155_s22 = sadd.s32 4294967295, %s1094_s21   ;;  %s1158_s23 = sadd.s32 1, %s1094_s21   ;;  %s1094_s21 = sphi %s1142_s21, %s1349_s21   ;;  %s1090_s20 = sphi %s1140_s20, %s1348_s20   ;;  %s1086_s19 = sphi %s1138_s19, %s1347_s19   ;;  %s1082_s18 = sphi %s1136_s18, %s1346_s18  }
   0x5   : > { %s23_s24 = ssub.s32 %s1094_s21, %s1158_s23  ;;  %s26_s25 = sadd.s32 1, %s1090_s20 }
   0x6   : > { %p24_p0 = scmp.eq.s32.totalorder %s23_s24, 0  ;;  %p33_p1 = scmp.ne.s32.totalorder %s1090_s20, %s1086_s19 }
   0x7   : > { %p34_p2 = scmp.eq.s32.totalorder %s1094_s21, 0  ;;  %p39_p3 = scmp.ne.s32.totalorder %s1086_s19, %s1082_s18 }
   0x8   : > { %s1168_s26 = scalar_select %p24_p0, %s1090_s20, %s26_s25  }
   0x9   : > { %p35_p4 = por %p34_p2, %p33_p1  ;;  %p40_p5 = scmp.eq.s32.totalorder %s1155_s22, 0 }
   0xa   : > { %p952_p6 = scmp.lt.s32.totalorder %s1094_s21, 2  ;;  %s180_s28 = sand.u32 1, %s1090_s20  }
   0xb   : > { %p1172_p7 = por %p40_p5, %p39_p3  ;;  %s861_s29 = sshll.u32 %s180_s28, 8 }
   0xc   : > { %s880_s30 = sshll.u32 %s1094_s21, 9  ;;  %s184_s9 = scalar_lea.vmem [#allocation4], %s861_s29 }
   0xd   : > { %s1181_s8 = scalar_lea.hbm %s1338_s0, %s880_s30  ;;  %s191_s10 = sshll.u32 %s184_s9, 4  ;;  %s1183_s10 = int_to_ptr.vmem [resolvable:$true] %s191_s10 }
   0xe   : > { %p1185_p8 = pnand %p952_p6, %p35_p4  ;;  %s1189_s12 = scalar_lea.sflag [#allocation5], %s180_s28 }
   0xf   : > { %s1000_s13 = scalar_lea.hbm %s1181_s8, 4096  ;;  %s1005_s16 = scalar_lea.hbm %s1338_s0, 8192 }
  0x10   : > { %p1001_p9 = scmp.ne.s32.totalorder %s1181_s8, %s1000_s13  ;;  %p1002_p10 = pneg %p1185_p8 }
  0x11   : > { %p1006_p13 = scmp.lt.u32.totalorder %s1181_s8, %s1338_s0  ;;  %p1007_p0 = scmp.lt.u32.totalorder %s1005_s16, %s1000_s13 }
  0x12   : > { %p1003_p11 = pnand %p1002_p10, %p1001_p9  ;;  %p1009_p2 = scmp.lt.u32.totalorder %s1000_s13, %s1181_s8 }
  0x13   : > { %p1008_p1 = por %p1007_p0, %p1006_p13 }
  0x14   : > { %p1004_p12 = pneg %p1003_p11 }
  0x15   : > { %p1010_p3 = por %p1009_p2, %p1008_p1 }
  0x17   : > { %p1011_p4 = pnand %p1010_p3, %p1004_p12 }
  0x19   : > { %1014 = shalt.err (!%p1011_p4)
}
  0x1a   : > { %s1015_s24 = scalar_lea.vmem %s1183_s10, 4096  ;;  %s1096_s25 = smov [#allocation4]  }
  0x1b   : > { %p1016_p5 = scmp.ne.s32.totalorder %s1183_s10, %s1015_s24  ;;  %s1020_s28 = sshll.u32 %s1096_s25, 4  ;;  %s1021_s28 = int_to_ptr.vmem [resolvable:$false] %s1020_s28 }
  0x1c   : > { %s1022_s29 = scalar_lea.vmem %s1021_s28, 8192  ;;  %p1023_p11 = scmp.lt.s32.totalorder %s1183_s10, %s1021_s28 }
  0x1d   : > { %p1018_p6 = pnand %p1016_p5, %p1002_p10  ;;  %p1024_p13 = scmp.lt.s32.totalorder %s1022_s29, %s1015_s24 }
  0x1f   : > { %p1019_p9 = pneg %p1018_p6  ;;  %p1025_p0 = por %p1024_p13, %p1023_p11 }
  0x21   : > { %p1026_p1 = pnand %p1025_p0, %p1019_p9 }
  0x23   : > { %1029 = shalt.err (!%p1026_p1)
}
  0x24   : > { %s1097_s30 = smov 1024   ;;  %s1098_s6 = smov 512  }
  0x25   : > { %s1099_s7 = smov 32   ;;  %p864_p10 = scmp.ge.s32.totalorder %s1094_s21, 1 }
  0x26   : > { %951 = dma.hbm_to_vmem [thread:$0]  (!%p1185_p8), %s1181_s8, 4096, %s1183_s10, %s1189_s12, %s1097_s30, %s1098_s6, %s1099_s7  }
  0x27   : > { %p199_p12 = scmp.lt.s32.totalorder %s1094_s21, 3 }
  0x29   : > { %p200_p2 = pnand %p864_p10, %p199_p12 }
  0x2a   : > { %s205_s9 = sand.u32 (!%p200_p2), 1, %s1086_s19  }
  0x2b   : > { %203 = sbr.rel (%p200_p2) target bundleno = 737 (0x2e1), region = 40  ;;  %s865_s13 = sshll.u32 (!%p200_p2), %s205_s9, 8 }
  0x2c   : > { %s206_s14 = scalar_lea.sflag (!%p200_p2), [#allocation5], %s205_s9  ;;  %s1220_s15 = scalar_lea.vmem (!%p200_p2), [#allocation4], %s865_s13 }
  0x32   : > { %1073 = dma.done.wait (%p1172_p7), %s206_s14, 4096  }
  0x33   : > { %1075 = vsyncadd (%p1172_p7), %s206_s14, 4294963200  ;;  %p866_p3 = scmp.ne.s32.totalorder %s1155_s22, 0 }
  0x34   : > { %vm236_vm0 = vcmask (!%p866_p3), 254976   ;;  %v1100_v0 = vmov (!%p866_p3), 0.0   ;;  %v1101_v1 = vmov (!%p866_p3), -inf  }
  0x35   : > { %235 = sbr.rel (%p866_p3) target bundleno = 60 (0x3c), region = 48  ;;  %237 = vst.msk [vmem:[#allocation2] sm:$0x3] (!%p866_p3), %vm236_vm0, %v1100_v0  ;;  %238 = vst.msk [vmem:[#allocation3] sm:$0x3] (!%p866_p3), %vm236_vm0, %v1101_v1 }
  0x3c PF: > { %v255_v2 = vld [vmem:[%s1220_s15 + $0x80] sm:$0xff]  ;;  %v256_v3 = vld [vmem:[%s1220_s15 + $0x88] sm:$0xff]  ;;  %v257_v4 = vld [vmem:[%s1220_s15 + $0x90] sm:$0xff]  ;;  %vm331_vm1 = vcmask 130112   ;;  %vm338_vm2 = vcmask 195712   ;;  %vm345_vm3 = vcmask 261312  }
  0x3d   : > { %v292_v5 = vadd.f32 %v256_v3, %v255_v2  ;;  %v239_v6 = vld [vmem:[%s1220_s15] sm:$0xff]  ;;  %v240_v7 = vld [vmem:[%s1220_s15 + $0x8] sm:$0xff]  ;;  %v258_v8 = vld [vmem:[%s1220_s15 + $0x98] sm:$0xff]  ;;  %v393_v34 = vmax.f32 %v255_v2, %v256_v3  ;;  %vm366_vm4 = vcmask 1041409   ;;  %vm370_vm5 = vcmask 254976   ;;  %p867_p7 = scmp.ne.s32.totalorder %s1155_s22, 1 }
  0x3e   : > { %v241_v9 = vld [vmem:[%s1220_s15 + $0x10] sm:$0xff]  ;;  %v272_v10 = vadd.f32 %v240_v7, %v239_v6  ;;  %v259_v11 = vld [vmem:[%s1220_s15 + $0xa0] sm:$0xff]  ;;  %v242_v13 = vld [vmem:[%s1220_s15 + $0x18] sm:$0xff]  ;;  %v373_v21 = vmax.f32 %v239_v6, %v240_v7  ;;  %vm1103_vm6 = vmmov (!%p867_p7), 0   ;;  %vm481_vm7 = vcmask (!%p867_p7), 261120  }
  0x3f   : > { %v293_v12 = vadd.f32 %v292_v5, %v257_v4  ;;  %v260_v14 = vld [vmem:[%s1220_s15 + $0xa8] sm:$0xff]  ;;  %v261_v15 = vld [vmem:[%s1220_s15 + $0xb0] sm:$0xff]  ;;  %v243_v18 = vld [vmem:[%s1220_s15 + $0x20] sm:$0xff]  ;;  %v394_v44 = vmax.f32 %v393_v34, %v257_v4  ;;  %vm570_vm8 = vcmask (!%p867_p7), 1041408   ;;  %vm566_vm9 = vcmask (!%p867_p7), 15360  }
  0x40   : > { %v273_v16 = vadd.f32 %v272_v10, %v241_v9  ;;  %v297_v17 = vadd.f32 %v260_v14, %v259_v11  ;;  %v244_v19 = vld [vmem:[%s1220_s15 + $0x28] sm:$0xff]  ;;  %v245_v20 = vld [vmem:[%s1220_s15 + $0x30] sm:$0xff]  ;;  %v262_v23 = vld [vmem:[%s1220_s15 + $0xb8] sm:$0xff]  ;;  %v398_v31 = vmax.f32 %v259_v11, %v260_v14  ;;  %v374_v33 = vmax.f32 %v373_v21, %v241_v9 }
  0x41   : > { %v294_v22 = vadd.f32 %v293_v12, %v258_v8  ;;  %v277_v24 = vadd.f32 %v244_v19, %v243_v18  ;;  %v378_v25 = vmax.f32 %v243_v18, %v244_v19  ;;  %v246_v28 = vld [vmem:[%s1220_s15 + $0x38] sm:$0xff]  ;;  %v263_v35 = vld [vmem:[%s1220_s15 + $0xc0] sm:$0xff]  ;;  %v264_v36 = vld [vmem:[%s1220_s15 + $0xc8] sm:$0xff]  ;;  %v395_v51 = vmax.f32 %v394_v44, %v258_v8 }
  0x42   : > { %v274_v26 = vadd.f32 %v273_v16, %v242_v13  ;;  %v298_v27 = vadd.f32 %v297_v17, %v261_v15  ;;  %v247_v38 = vld [vmem:[%s1220_s15 + $0x40] sm:$0xff]  ;;  %v248_v39 = vld [vmem:[%s1220_s15 + $0x48] sm:$0xff]  ;;  %v399_v41 = vmax.f32 %v398_v31, %v261_v15  ;;  %v302_v42 = vadd.f32 %v264_v36, %v263_v35  ;;  %v265_v45 = vld [vmem:[%s1220_s15 + $0xd0] sm:$0xff] }
  0x43   : > { %295 = vadd.xlane.f32.xlu1 %v294_v22  ;;  %v278_v29 = vadd.f32 %v277_v24, %v245_v20  ;;  %v379_v30 = vmax.f32 %v378_v25, %v245_v20  ;;  %v375_v43 = vmax.f32 %v374_v33, %v242_v13  ;;  %v282_v46 = vadd.f32 %v248_v39, %v247_v38  ;;  %v249_v47 = vld [vmem:[%s1220_s15 + $0x50] sm:$0xff]  ;;  %v266_v52 = vld [vmem:[%s1220_s15 + $0xd8] sm:$0xff]  ;;  %v267_v55 = vld [vmem:[%s1220_s15 + $0xe0] sm:$0xff] }
  0x44   : > { %275 = vadd.xlane.f32.xlu0 %v274_v26  ;;  %v299_v32 = vadd.f32 %v298_v27, %v262_v23  ;;  %v400_v48 = vmax.f32 %v399_v41, %v262_v23  ;;  %v303_v49 = vadd.f32 %v302_v42, %v265_v45  ;;  %v403_v50 = vmax.f32 %v263_v35, %v264_v36  ;;  %v268_v56 = vld [vmem:[%s1220_s15 + $0xe8] sm:$0xff]  ;;  %v250_v57 = vld [vmem:[%s1220_s15 + $0x58] sm:$0xff]  ;;  %v251_v58 = vld [vmem:[%s1220_s15 + $0x60] sm:$0xff] }
  0x45   : > { %v279_v37 = vadd.f32 %v278_v29, %v246_v28  ;;  %v380_v40 = vmax.f32 %v379_v30, %v246_v28  ;;  %v283_v53 = vadd.f32 %v282_v46, %v249_v47  ;;  %v383_v54 = vmax.f32 %v247_v38, %v248_v39  ;;  %v252_v59 = vld [vmem:[%s1220_s15 + $0x68] sm:$0xff]  ;;  %v269_v1 = vld [vmem:[%s1220_s15 + $0xf0] sm:$0xff]  ;;  %v270_v8 = vld [vmem:[%s1220_s15 + $0xf8] sm:$0xff] }
  0x46   : > { %v304_v60 = vadd.f32 %v303_v49, %v266_v52  ;;  %v404_v61 = vmax.f32 %v403_v50, %v265_v45  ;;  %v307_v62 = vadd.f32 %v268_v56, %v267_v55  ;;  %v287_v2 = vadd.f32 %v252_v59, %v251_v58  ;;  %v253_v3 = vld [vmem:[%s1220_s15 + $0x70] sm:$0xff]  ;;  %v254_v11 = vld [vmem:[%s1220_s15 + $0x78] sm:$0xff] }
  0x47   : > { %300 = vadd.xlane.f32.xlu1 %v299_v32  ;;  %v284_v63 = vadd.f32 %v283_v53, %v250_v57  ;;  %v384_v0 = vmax.f32 %v383_v54, %v249_v47  ;;  %v408_v6 = vmax.f32 %v267_v55, %v268_v56  ;;  %v388_v10 = vmax.f32 %v251_v58, %v252_v59 }
  0x48   : > { %280 = vadd.xlane.f32.xlu0 %v279_v37  ;;  %v405_v4 = vmax.f32 %v404_v61, %v266_v52  ;;  %v308_v5 = vadd.f32 %v307_v62, %v269_v1  ;;  %v288_v9 = vadd.f32 %v287_v2, %v253_v3  ;;  %v320_v22 = vlaneseq  ;;  %v271_v61 = vld [vmem:[#allocation2] sm:$0x3] }
  0x49   : > { %v385_v7 = vmax.f32 %v384_v0, %v250_v57  ;;  %v409_v13 = vmax.f32 %v408_v6, %v269_v1  ;;  %v389_v15 = vmax.f32 %v388_v10, %v253_v3  ;;  %v372_v10 = vld [vmem:[#allocation3] sm:$0x3] }
  0x4a   : > { %v309_v12 = vadd.f32 %v308_v5, %v270_v8  ;;  %v289_v14 = vadd.f32 %v288_v9, %v254_v11  ;;  %v321_v25 = vand.u32 127, %v320_v22  ;;  %v323_v29 = vshrl.u32 %v320_v22, 7 }
  0x4b   : > { %381 = vmax.xlane.f32.xlu1 %v380_v40  ;;  %v410_v16 = vmax.f32 %v409_v13, %v270_v8  ;;  %v390_v17 = vmax.f32 %v389_v15, %v254_v11  ;;  %v471_v15 = vld [vmem:[%s1339_s1 + $0x8] sm:$0xff] (!%p867_p7) }
  0x4c   : > { %376 = vmax.xlane.f32.xlu0 %v375_v43  ;;  %v326_v26 = vadd.s32 4294967288, %v321_v25  ;;  %v333_v30 = vadd.s32 4294967280, %v321_v25  ;;  %v340_v34 = vadd.s32 4294967272, %v321_v25  ;;  %v324_v35 = vsub.s32 %v321_v25, %v323_v29  ;;  %v558_v25 = vld [vmem:[%s1341_s3] sm:$0x3] (!%p867_p7) }
  0x4e   : > { %v329_v31 = vsub.s32 %v326_v26, %v323_v29  ;;  %v336_v36 = vsub.s32 %v333_v30, %v323_v29  ;;  %v343_v41 = vsub.s32 %v340_v34, %v323_v29  ;;  %v868_v26 = vld [vmem:[%s1340_s2] ss:$0 sm:$0xff] (!%p867_p7) }
  0x4f   : > { %401 = vmax.xlane.f32.xlu1 %v400_v48 }
  0x50   : > { %396 = vmax.xlane.f32.xlu0 %v395_v51 }
  0x53   : > { %305 = vadd.xlane.f32.xlu1 %v304_v60 }
  0x54   : > { %285 = vadd.xlane.f32.xlu0 %v284_v63 }
  0x57   : > { %406 = vmax.xlane.f32.xlu1 %v405_v4 }
  0x58   : > { %386 = vmax.xlane.f32.xlu0 %v385_v7 }
  0x5b   : > { %310 = vadd.xlane.f32.xlu1 %v309_v12 }
  0x5c   : > { %290 = vadd.xlane.f32.xlu0 %v289_v14  ;;  %v470_v14 = vld [vmem:[%s1339_s1] sm:$0xff] (!%p867_p7) }
  0x5f   : > { %411 = vmax.xlane.f32.xlu1 %v410_v16  ;;  %v472_v16 = vld [vmem:[%s1339_s1 + $0x10] sm:$0xff] (!%p867_p7) }
  0x60   : > { %391 = vmax.xlane.f32.xlu0 %v390_v17  ;;  %v1102_v17 = vmov (!%p867_p7), 0.0|0.0  }
  0x61   : > { %927 = vmatprep.subr.bf16.mxu0 (!%p867_p7), %v1102_v17  ;;  %933 = vmatprep.subr.bf16.mxu1 (!%p867_p7), %v1102_v17 }
  0xd0   : > { %v296_v18 = vpop.xlane.xlu1 %295 }
  0xd1   : > { %v276_v19 = vpop.xlane.xlu0 %275  ;;  %v350_v42 = vrot.slane %v296_v18, %v324_v35  ;;  %v928_v18 = vpack.c.bf16 (!%p867_p7), %v471_v15, %v470_v14 }
  0xd2   : > { %v325_v43 = vrot.slane %v276_v19, %v324_v35  ;;  %v473_v19 = vld [vmem:[%s1339_s1 + $0x18] sm:$0xff] (!%p867_p7) }
  0xd3   : > { %929 = vmatpush3.bf16.msra.mxu0 (!%p867_p7), %v928_v18  ;;  %935 = vmatpush3.bf16.msra.mxu1 (!%p867_p7), %v928_v18 }
  0xd4   : > { %v301_v20 = vpop.xlane.xlu1 %300  ;;  %930 = vmatprep.subr.bf16.mxu0 (!%p867_p7), %v1102_v17  ;;  %936 = vmatprep.subr.bf16.mxu1 (!%p867_p7), %v1102_v17 }
  0xd5   : > { %v281_v21 = vpop.xlane.xlu0 %280  ;;  %v354_v37 = vrot.slane %v301_v20, %v329_v31  ;;  %v1104_v20 = vmov (!%p867_p7), 0.0  }
  0xd6   : > { %v330_v38 = vrot.slane %v281_v21, %v329_v31  ;;  %903 = vmatprep.mubr.msk.f32.mxu0 (!%p867_p7), %vm1103_vm6, %v1104_v20  ;;  %919 = vmatprep.mubr.msk.f32.mxu1 (!%p867_p7), %vm1103_vm6, %v1104_v20  ;;  %v931_v21 = vpack.c.bf16 (!%p867_p7), %v473_v19, %v472_v16 }
  0xd7   : > { %v355_v46 = vsel %vm331_vm1, %v354_v37, %v350_v42  ;;  %v870_v37 = vld [vmem:[%s1342_s4] ss:$0 sm:$0xff] (!%p867_p7) }
  0xd8   : > { %v382_v23 = vpop.xlane.xlu1 %381  ;;  %v332_v47 = vsel %vm331_vm1, %v330_v38, %v325_v43  ;;  %932 = vmatpush3.bf16.msra.mxu0 (!%p867_p7), %v931_v21  ;;  %938 = vmatpush3.bf16.msra.mxu1 (!%p867_p7), %v931_v21  ;;  %v939_v38 = vadd.f32 (!%p867_p7), %v870_v37, %v870_v37 }
  0xd9   : > { %v377_v24 = vpop.xlane.xlu0 %376  ;;  %v428_v49 = vrot.slane %v382_v23, %v329_v31  ;;  %906 = vmatprep.subr.mxu0 (!%p867_p7), %v1104_v20  ;;  %922 = vmatprep.subr.mxu1 (!%p867_p7), %v1104_v20 }
  0xda   : > { %v424_v54 = vrot.slane %v377_v24, %v324_v35 }
  0xdc   : > { %v402_v27 = vpop.xlane.xlu1 %401  ;;  %v429_v4 = vsel %vm331_vm1, %v428_v49, %v424_v54 }
  0xdd   : > { %v397_v28 = vpop.xlane.xlu0 %396  ;;  %v447_v50 = vrot.slane %v402_v27, %v329_v31 }
  0xde   : > { %v443_v51 = vrot.slane %v397_v28, %v324_v35 }
  0xe0   : > { %v306_v32 = vpop.xlane.xlu1 %305  ;;  %v448_v0 = vsel %vm331_vm1, %v447_v50, %v443_v51 }
  0xe1   : > { %v286_v33 = vpop.xlane.xlu0 %285  ;;  %v359_v44 = vrot.slane %v306_v32, %v336_v36 }
  0xe2   : > { %v337_v45 = vrot.slane %v286_v33, %v336_v36 }
  0xe3   : > { %v360_v55 = vsel %vm338_vm2, %v359_v44, %v355_v46 }
  0xe4   : > { %v407_v39 = vpop.xlane.xlu1 %406  ;;  %v339_v58 = vsel %vm338_vm2, %v337_v45, %v332_v47 }
  0xe5   : > { %v387_v40 = vpop.xlane.xlu0 %386  ;;  %v452_v56 = vrot.slane %v407_v39, %v336_v36 }
  0xe6   : > { %v433_v59 = vrot.slane %v387_v40, %v336_v36 }
  0xe7   : > { %v453_v5 = vsel %vm338_vm2, %v452_v56, %v448_v0 }
  0xe8   : > { %v311_v48 = vpop.xlane.xlu1 %310  ;;  %v434_v8 = vsel %vm338_vm2, %v433_v59, %v429_v4 }
  0xe9   : > { %v364_v52 = vrot.slane %v311_v48, %v343_v41  ;;  %v291_v53 = vpop.xlane.xlu0 %290 }
  0xea   : > { %v344_v57 = vrot.slane %v291_v53, %v343_v41 }
  0xeb   : > { %v365_v60 = vsel %vm345_vm3, %v364_v52, %v360_v55 }
  0xec   : > { %v346_v62 = vsel %vm345_vm3, %v344_v57, %v339_v58  ;;  %v412_v63 = vpop.xlane.xlu1 %411 }
  0xed   : > { %v367_v1 = vsel %vm366_vm4, %v365_v60, %v346_v62  ;;  %v457_v2 = vrot.slane %v412_v63, %v343_v41  ;;  %v392_v3 = vpop.xlane.xlu0 %391 }
  0xee   : > { %v369_v6 = vadd.f32 %v367_v1, %v271_v61  ;;  %v438_v7 = vrot.slane %v392_v3, %v343_v41  ;;  %466 = sbr.rel (%p867_p7) target bundleno = 712 (0x2c8), region = 52 }
  0xef   : > { %v458_v9 = vsel %vm345_vm3, %v457_v2, %v453_v5 }
  0xf0   : > { %371 = vst.msk [vmem:[#allocation2] sm:$0x3] %vm370_vm5, %v369_v6  ;;  %v439_v11 = vsel %vm345_vm3, %v438_v7, %v434_v8 }
  0xf1   : > { %v459_v12 = vsel %vm366_vm4, %v458_v9, %v439_v11 }
  0xf2   : > { %v461_v13 = vmax.f32 %v372_v10, %v459_v12 }
  0xf4   : > { %462 = vst.msk [vmem:[#allocation3] sm:$0x3] %vm370_vm5, %v461_v13 }
  0xf7   : > { %v467_v22 = vld [vmem:[#allocation2] sm:$0x3] }
  0xf8   : > { %v468_v23 = vmul.f32 0.0009765625, %v467_v22 }
  0xfa   : > { %904 = vmatmul.mubr.msk.f32.vlgmr.msra.gmra.mrb[0].mxu0 %vm481_vm7, %v468_v23 }
  0xfb   : > { %v469_v24 = vld [vmem:[#allocation3] sm:$0x3]  ;;  %908 = vmatprep.mubr.msk.f32.mxu0 %vm1103_vm6, %v1104_v20  ;;  %907 = vmatpush3.msk.msra.mxu0 %vm570_vm8, %v558_v25 }
  0xfc   : > { %920 = vmatmul.mubr.msk.f32.vlgmr.msra.gmra.mrb[0].mxu1 %vm481_vm7, %v469_v24 }
  0xfd   : > { %924 = vmatprep.mubr.msk.f32.mxu1 %vm1103_vm6, %v1104_v20  ;;  %923 = vmatpush3.msk.msra.mxu1 %vm570_vm8, %v558_v25 }
 0x1cd   : > { %v551_v27 = vpop.f32.mrb[0].mxu0 }
 0x1ce   : > { %v552_v29 = vadd.f32 %v868_v26, %v551_v27  ;;  %v905_v31 = vpop.f32.mrb[1].mxu0 }
 0x1cf   : > { %v713_v28 = vpop.f32.mrb[0].mxu1 }
 0x1d0   : > { %v714_v30 = vadd.f32 %v868_v26, %v713_v28  ;;  %v921_v32 = vpop.f32.mrb[1].mxu1  ;;  %vm555_vm10 = vcmp.gt.f32.partialorder %v552_v29, 0.0  ;;  %v556_v33 = vmul.f32 0.01, %v552_v29 }
 0x1d2   : > { %vm717_vm11 = vcmp.gt.f32.partialorder %v714_v30, 0.0  ;;  %v718_v34 = vmul.f32 0.01, %v714_v30  ;;  %v557_v35 = vsel %vm555_vm10, %v552_v29, %v556_v33 }
 0x1d3   : > { %909 = vmatmul.mubr.msk.f32.vlgmr.msra.gmra.mrb[2].mxu0 %vm566_vm9, %v557_v35 }
 0x1d4   : > { %v719_v36 = vsel %vm717_vm11, %v714_v30, %v718_v34 }
 0x1d5   : > { %925 = vmatmul.mubr.msk.f32.vlgmr.msra.gmra.mrb[2].mxu1 %vm566_vm9, %v719_v36 }
 0x2a6   : > { %v640_v39 = vpop.f32.mrb[2].mxu0 }
 0x2a7   : > { %v940_v41 = vadd.f32 %v939_v38, %v640_v39  ;;  %v910_v42 = vpop.f32.mrb[3].mxu0 }
 0x2a8   : > { %v789_v40 = vpop.f32.mrb[2].mxu1 }
 0x2a9   : > { %v926_v43 = vpop.f32.mrb[3].mxu1  ;;  %v941_v44 = vadd.f32 %v940_v41, %v789_v40 }
 0x2ab   : > { %v794_v45 = vsub.f32 0.0, %v941_v44 }
 0x2ad   : > { %v795_v46 = vmul.f32 1.442695, %v794_v45 }
 0x2af   : > { %996 = vpow2.f32 %v795_v46 }
 0x2b9   : > { %v997_v47 = vpop.eup %996 }
 0x2ba   : > { %v797_v48 = vadd.f32 1.0, %v997_v47 }
 0x2bc   : > { %998 = vrcp.f32 %v797_v48 }
 0x2c6   : > { %v999_v49 = vpop.eup %998 }
 0x2c7   : > { %800 = vst.msk [vmem:[#allocation7] sm:$0x3] %vm370_vm5, %v999_v49 }
 0x2c8 PF: > { %p953_p8 = scmp.eq.s32.totalorder %s1155_s22, 1  ;;  %s1105_s6 = smov [#allocation7]  }
 0x2c9   : > { %s808_s7 = sshll.u32 %s1105_s6, 4  ;;  %s809_s7 = int_to_ptr.vmem [resolvable:$true] %s808_s7 }
 0x2ca   : > { %s1030_s9 = scalar_lea.vmem %s809_s7, 32  ;;  %p1037_p9 = scmp.lt.s32.totalorder %s809_s7, %s809_s7 }
 0x2cb   : > { %p1031_p4 = scmp.ne.s32.totalorder %s809_s7, %s1030_s9  ;;  %p1038_p11 = scmp.lt.s32.totalorder %s1030_s9, %s1030_s9 }
 0x2cd   : > { %p1032_p5 = pnand %p1031_p4, %p953_p8  ;;  %p1039_p13 = por %p1038_p11, %p1037_p9 }
 0x2cf   : > { %p1033_p6 = pneg %p1032_p5 }
 0x2d1   : > { %p1040_p0 = pnand %p1039_p13, %p1033_p6 }
 0x2d3   : > { %1043 = shalt.err (!%p1040_p0)
}
 0x2d4   : > { %s1044_s15 = scalar_lea.hbm %s1343_s5, 32 }
 0x2d5   : > { %p1045_p1 = scmp.ne.s32.totalorder %s1343_s5, %s1044_s15  ;;  %p1050_p2 = scmp.lt.u32.totalorder %s1044_s15, %s1343_s5 }
 0x2d7   : > { %p1046_p10 = pnand %p1045_p1, %p953_p8 }
 0x2d9   : > { %p1047_p12 = pneg %p1046_p10 }
 0x2db   : > { %p1052_p3 = pnand %p1050_p2, %p1047_p12 }
 0x2dd   : > { %1055 = shalt.err (!%p1052_p3)
}
 0x2de   : > { %945 = dma.vmem_to_hbm [thread:$0]  (%p953_p8), %s809_s7, 32, %s1343_s5, [#allocation6]  }
 0x2df   : > { %1077 = dma.done.wait (%p953_p8), [#allocation6], 32  }
 0x2e0   : > { %1079 = vsyncadd (%p953_p8), [#allocation6], 4294967264 }
 0x2e1 PF: > { %p16_p7 = scmp.ge.s32.totalorder %s1158_s23, 4   ;;  %s1346_s18 = smov %s1086_s19 }
 0x2e2   : > { %s1347_s19 = smov %s1090_s20  ;;  %s1348_s20 = smov %s1168_s26 }
 0x2e3   : > { %s1349_s21 = smov %s1158_s23  ;;  %18 = sbr.rel (!%p16_p7) target bundleno = 4 (0x4), region = 85 }
 0x2ea   :  { %821 = vsyncpa [#allocation5], 1 }
 0x2eb   :  { %823 = vsyncpa [#allocation5 + $0x1], 1 }
 0x2ec   :  { %824 = vsyncpa [#allocation6], 1 }
 0x2ed   :  { %826 = vsyncpa [#allocation6 + $0x1], 1 }

</bundles_post_ra>
